<compile_context>
chip_gen: v6e
topology: v6e:2x2x1
jax: 0.10.0
libtpu: 0.0.40
codegen_flags: <defaults>
</compile_context>

<pallas_src>
import functools

import jax
import jax.numpy as jnp
from jax.experimental import pallas as pl
from jax.experimental.pallas import tpu as pltpu


def _round_up(v: int, m: int) -> int:
    return (v + m - 1) // m * m


# ----------------------------------------------------------------------------
# Pallas kernel
# ----------------------------------------------------------------------------
def _laat_cpt_kernel(
    x_ref,       # [BB*Tp, D]      bf16  flattened input slab (BB examples)
    w1_ref,      # [D, P]          bf16  first_linear.weight^T
    watt_ref,    # [P, TILE_C]     bf16  folded hierarchical attention weight
    batt_ref,    # [1, TILE_C]     f32   folded hierarchical attention bias
    woutT_ref,   # [D, TILE_C]     bf16  third_linear.weight^T tile
    bout_ref,    # [1, TILE_C]     f32   third_linear.bias tile
    out_ref,     # [1, BB, TILE_C] f32
    w_scratch,   # [BB*Tp, P]      bf16  tanh(x @ w1^T), reused across class tiles
    *,
    seq_len: int,
    seq_pad: int,
    batch_block: int,
):
    BB = batch_block
    Tp = seq_pad
    TILE_C = out_ref.shape[-1]

    # Projection + tanh computed once per batch block (class tile 0), cached in
    # VMEM scratch; reused by every class tile of this batch block (the class
    # axis is the innermost, "arbitrary" grid axis -> sequential on one core).
    @pl.when(pl.program_id(1) == 0)
    def _():
        w = jnp.tanh(jnp.dot(x_ref[...], w1_ref[...],
                             preferred_element_type=jnp.float32))
        w_scratch[...] = w.astype(jnp.bfloat16)

    # Folded hierarchical-CPT attention logits for this class tile.
    att = jnp.dot(w_scratch[...], watt_ref[...],
                  preferred_element_type=jnp.float32) + batt_ref[...]
    att = att.reshape(BB, Tp, TILE_C)

    if seq_pad != seq_len:
        # Mask padded sequence positions out of the softmax.
        t_ids = jax.lax.broadcasted_iota(jnp.int32, (BB, Tp, TILE_C), 1)
        att = jnp.where(t_ids < seq_len, att, -1e30)

    # Softmax over the sequence axis (torch dim=1), kept in f32.
    m = jnp.max(att, axis=1, keepdims=True)                    # [BB, 1, TILE_C]
    ex = jnp.exp(att - m)
    denom = jnp.sum(ex, axis=1, keepdims=True)
    att = ex * pl.reciprocal(denom, approx=True)               # [BB, Tp, TILE_C]

    # Y = x @ wout^T  (== attention pooling + per-class dot with wout).
    y = jnp.dot(x_ref[...], woutT_ref[...],
                preferred_element_type=jnp.float32).reshape(BB, Tp, TILE_C)

    out = jnp.sum(att * y, axis=1) + bout_ref[...]             # [BB, TILE_C]
    out_ref[...] = out.reshape(out_ref.shape).astype(out_ref.dtype)


# ----------------------------------------------------------------------------
# Wrapper
# ----------------------------------------------------------------------------
def label_attention_hierarchical_cpt(x, params, *, batch_block=8, class_tile=512):
    """x: [B, T, D] float32.  Returns [B, num_classes] float32."""
    B, T, D = x.shape
    P = params["w1"].shape[0]
    C = params["wf"].shape[0]
    f32 = jnp.float32

    # --- fold the 5 (embedding, permutation) pairs: exact linear identity ----
    W_att = (params["wf"].T @ params["pall"]
             + params["e4"].T @ params["p4"]
             + params["e3"].T @ params["p3"]
             + params["e2"].T @ params["p2"]
             + params["e1"].T @ params["p1"]).astype(f32)      # [P, C]
    b_att = (params["bf"] @ params["pall"]
             + params["be4"] @ params["p4"]
             + params["be3"] @ params["p3"]
             + params["be2"] @ params["p2"]
             + params["be1"] @ params["p1"]).astype(f32)       # [C]

    # --- tiling choices -------------------------------------------------------
    TILE_C = min(_round_up(class_tile, 128), _round_up(C, 128))  # lane-dense
    Cp = _round_up(C, TILE_C)
    n_class_tiles = Cp // TILE_C
    pad_c = Cp - C

    BB = max(1, min(batch_block, B))
    # Keep >= 2 batch grid steps when possible so both v7x TensorCores get work.
    while BB > 1 and -(-B // BB) < 2:
        BB //= 2
    B_pad = _round_up(B, BB)
    n_batch_blocks = B_pad // BB

    Tp = _round_up(T, 8)            # sublane-friendly reshape [BB*Tp,C]->[BB,Tp,C]
    bbt = BB * Tp

    # --- pad class dim, cast MXU operands to bf16 -----------------------------
    w1t = params["w1"].T.astype(jnp.bfloat16)                              # [D, P]
    W_att = jnp.pad(W_att, ((0, 0), (0, pad_c))).astype(jnp.bfloat16)      # [P, Cp]
    b_att = jnp.pad(b_att, (0, pad_c)).reshape(1, Cp).astype(f32)          # [1, Cp]
    woutT = jnp.pad(params["wout"].T.astype(f32),
                    ((0, 0), (0, pad_c))).astype(jnp.bfloat16)             # [D, Cp]
    bout = jnp.pad(params["bout"], (0, pad_c)).reshape(1, Cp).astype(f32)  # [1, Cp]

    # --- pad batch/seq and flatten to [B_pad*Tp, D] ---------------------------
    xp = x
    if B_pad != B or Tp != T:
        xp = jnp.pad(x, ((0, B_pad - B), (0, Tp - T), (0, 0)))
    xp = xp.reshape(B_pad * Tp, D).astype(jnp.bfloat16)

    # --- VMEM budget / cost estimate -------------------------------------------
    vmem_est = (
        2 * bbt * D * 2                                     # x slab (dbl-buffered)
        + 2 * D * P * 2                                     # w1^T
        + 2 * ((P + D) * TILE_C * 2 + 2 * TILE_C * 4)       # class-tiled weights
        + 2 * BB * TILE_C * 4                               # output tile
        + bbt * P * 2                                       # tanh scratch
        + 3 * bbt * TILE_C * 4                              # att / exp / y
    )
    vmem_limit = max(32 * 1024 * 1024, min(64 * 1024 * 1024, int(vmem_est * 2)))

    cost = pl.CostEstimate(
        flops=int(2 * B_pad * Tp * (D * P + P * Cp + D * Cp) + 4 * B_pad * Tp * Cp),
        transcendentals=int(B_pad * Tp * (P + Cp)),
        bytes_accessed=int(B_pad * Tp * D * 2
                           + n_batch_blocks * (D * P + (P + D) * Cp) * 2
                           + B_pad * Cp * 4),
    )

    kernel = functools.partial(_laat_cpt_kernel,
                               seq_len=T, seq_pad=Tp, batch_block=BB)

    out = pl.pallas_call(
        kernel,
        # Class axis innermost: the x-slab block index is constant along it,
        # so x is not re-DMA'd per class tile; the weight tiles stream.
        grid=(n_batch_blocks, n_class_tiles),
        in_specs=[
            pl.BlockSpec((bbt, D), lambda b, c: (b, 0)),        # x slab
            pl.BlockSpec((D, P), lambda b, c: (0, 0)),          # w1^T (constant)
            pl.BlockSpec((P, TILE_C), lambda b, c: (0, c)),     # folded att weight
            pl.BlockSpec((1, TILE_C), lambda b, c: (0, c)),     # folded att bias
            pl.BlockSpec((D, TILE_C), lambda b, c: (0, c)),     # wout^T tile
            pl.BlockSpec((1, TILE_C), lambda b, c: (0, c)),     # out bias tile
        ],
        out_specs=pl.BlockSpec((1, BB, TILE_C), lambda b, c: (b, 0, c)),
        out_shape=jax.ShapeDtypeStruct((n_batch_blocks, BB, Cp), jnp.float32),
        scratch_shapes=[pltpu.VMEM((bbt, P), jnp.bfloat16)],
        compiler_params=pltpu.CompilerParams(
            # Class axis must be "arbitrary": the tanh scratch written at
            # class tile 0 is reused by the later class tiles of a batch block.
            dimension_semantics=("parallel", "arbitrary"),
            vmem_limit_bytes=vmem_limit,
        ),
        cost_estimate=cost,
    )(xp, w1t, W_att, b_att, woutT, bout)

    out = out.reshape(B_pad, Cp)
    return out[:B, :C]


# ----------------------------------------------------------------------------
# Pure-JAX reference (mirrors the PyTorch forward) for a correctness check
# ----------------------------------------------------------------------------
def reference_forward(x, p):
    w = jnp.tanh(x @ p["w1"].T)
    att = (w @ p["wf"].T + p["bf"]) @ p["pall"]
    att += (w @ p["e4"].T + p["be4"]) @ p["p4"]
    att += (w @ p["e3"].T + p["be3"]) @ p["p3"]
    att += (w @ p["e2"].T + p["be2"]) @ p["p2"]
    att += (w @ p["e1"].T + p["be1"]) @ p["p1"]
    att = jax.nn.softmax(att, axis=1)            # softmax over seq dim
    att = jnp.swapaxes(att, 1, 2)                # [B, C, T]
    weighted = att @ x                           # [B, C, D]
    return jnp.sum(p["wout"][None] * weighted, axis=2) + p["bout"]


# ----------------------------------------------------------------------------
# Deterministic synthetic parameters
# ----------------------------------------------------------------------------
def make_params(key, D, P, C, n1, n2, n3, n4):
    ks = jax.random.split(key, 16)
    std = 0.03
    nrm = lambda k, s: (std * jax.random.normal(k, s)).astype(jnp.float32)

    # TODO(synk): create_permutations_cpt is external; synthesize deterministic
    # hierarchy aggregation matrices (class c -> group c % n_level) instead.
    def level_matrix(n):
        return jnp.eye(n, dtype=jnp.float32)[jnp.arange(C) % n].T  # [n, C]

    return {
        "w1":   nrm(ks[0], (P, D)),                 # first_linear.weight
        "wf":   nrm(ks[1], (C, P)),                 # full_embedding.weight
        "bf":   nrm(ks[2], (C,)),
        "e4":   nrm(ks[3], (n4, P)), "be4": nrm(ks[4], (n4,)),
        "e3":   nrm(ks[5], (n3, P)), "be3": nrm(ks[6], (n3,)),
        "e2":   nrm(ks[7], (n2, P)), "be2": nrm(ks[8], (n2,)),
        "e1":   nrm(ks[9], (n1, P)), "be1": nrm(ks[10], (n1,)),
        "pall": jnp.eye(C, dtype=jnp.float32),      # permutation_matrix_all
        "p4":   level_matrix(n4),
        "p3":   level_matrix(n3),
        "p2":   level_matrix(n2),
        "p1":   level_matrix(n1),
        "wout": nrm(ks[11], (C, D)),                # third_linear.weight
        "bout": nrm(ks[12], (C,)),                  # third_linear.bias
    }


if __name__ == "__main__":
    B, T, D, P, C = 2, 8, 32, 16, 10
    n1, n2, n3, n4 = 2, 3, 5, 7

    key = jax.random.PRNGKey(0)
    kx, kp = jax.random.split(key)
    x = jax.random.normal(kx, (B, T, D), dtype=jnp.float32)
    params = make_params(kp, D, P, C, n1, n2, n3, n4)

    out = label_attention_hierarchical_cpt(x, params)
    out = jax.block_until_ready(out)

    ref = jax.block_until_ready(reference_forward(x, params))
    assert out.shape == (B, C)
    # bf16 MXU operands + approx reciprocal => slightly looser tolerance.
    assert jnp.allclose(out, ref, rtol=2e-2, atol=2e-2), (out, ref)

    print("KERNEL_OK")
</pallas_src>

<mosaic_0001>
module attributes {stable_mosaic.version = 11 : i64} {
  func.func @_laat_cpt_kernel(%arg0: i32, %arg1: i32, %arg2: memref<8x32xbf16, #tpu.memory_space<vmem>>, %arg3: memref<32x16xbf16, #tpu.memory_space<vmem>>, %arg4: memref<16x128xbf16, #tpu.memory_space<vmem>>, %arg5: memref<1x128xf32, #tpu.memory_space<vmem>>, %arg6: memref<32x128xbf16, #tpu.memory_space<vmem>>, %arg7: memref<1x128xf32, #tpu.memory_space<vmem>>, %arg8: memref<1x1x128xf32, #tpu.memory_space<vmem>>, %arg9: memref<8x16xbf16, #tpu.memory_space<vmem>>) attributes {dimension_semantics = [#tpu.dimension_semantics<parallel>, #tpu.dimension_semantics<arbitrary>], iteration_bounds = array<i64: 2, 1>, scalar_prefetch = 0 : i64, scratch_operands = 1 : i64, tpu.core_type = #tpu.core_type<tc>, window_params = [{transform_indices = @transform_0, window_bounds = array<i64: 8, 32>}, {pipeline_mode = #tpu.pipeline_mode<synchronous>, transform_indices = @transform_1, window_bounds = array<i64: 32, 16>}, {transform_indices = @transform_2, window_bounds = array<i64: 16, 128>}, {transform_indices = @transform_3, window_bounds = array<i64: 1, 128>}, {transform_indices = @transform_4, window_bounds = array<i64: 32, 128>}, {transform_indices = @transform_5, window_bounds = array<i64: 1, 128>}, {transform_indices = @transform_6, window_bounds = array<i64: 1, 1, 128>}]} {
    %c0_i32 = arith.constant 0 : i32
    %0 = arith.cmpi eq, %arg1, %c0_i32 : i32
    %1 = arith.extui %0 : i1 to i32
    %c0_i32_0 = arith.constant 0 : i32
    %2 = arith.cmpi ne, %1, %c0_i32_0 : i32
    scf.if %2 {
      %c0_19 = arith.constant 0 : index
      %c0_20 = arith.constant 0 : index
      %30 = vector.load %arg2[%c0_19, %c0_20] : memref<8x32xbf16, #tpu.memory_space<vmem>>, vector<8x32xbf16>
      %c0_21 = arith.constant 0 : index
      %c0_22 = arith.constant 0 : index
      %31 = vector.load %arg3[%c0_21, %c0_22] : memref<32x16xbf16, #tpu.memory_space<vmem>>, vector<32x16xbf16>
      %cst_23 = arith.constant dense<0.000000e+00> : vector<8x16xf32>
      %32 = tpu.matmul %30, %31, %cst_23 {dimension_numbers = #tpu.dot_dimension_numbers<[1], [0], [0], [1], [0, 0, 1, 1], [], []>} : vector<8x32xbf16>, vector<32x16xbf16>, vector<8x16xf32> -> vector<8x16xf32>
      %33 = math.tanh %32 : vector<8x16xf32>
      %34 = arith.truncf %33 : vector<8x16xf32> to vector<8x16xbf16>
      %c0_24 = arith.constant 0 : index
      %c0_25 = arith.constant 0 : index
      %35 = vector.load %arg9[%c0_24, %c0_25] : memref<8x16xbf16, #tpu.memory_space<vmem>>, vector<8x16xbf16>
      tpu.vector_store %arg9[%c0_24, %c0_25], %34 {strides = array<i32>} : memref<8x16xbf16, #tpu.memory_space<vmem>>, vector<8x16xbf16>,
    } else {
    }
    %c0 = arith.constant 0 : index
    %c0_1 = arith.constant 0 : index
    %3 = vector.load %arg9[%c0, %c0_1] : memref<8x16xbf16, #tpu.memory_space<vmem>>, vector<8x16xbf16>
    %c0_2 = arith.constant 0 : index
    %c0_3 = arith.constant 0 : index
    %4 = vector.load %arg4[%c0_2, %c0_3] : memref<16x128xbf16, #tpu.memory_space<vmem>>, vector<16x128xbf16>
    %cst = arith.constant dense<0.000000e+00> : vector<8x128xf32>
    %5 = tpu.matmul %3, %4, %cst {dimension_numbers = #tpu.dot_dimension_numbers<[1], [0], [0], [1], [0, 0, 1, 1], [], []>} : vector<8x16xbf16>, vector<16x128xbf16>, vector<8x128xf32> -> vector<8x128xf32>
    %c0_4 = arith.constant 0 : index
    %c0_5 = arith.constant 0 : index
    %6 = vector.load %arg5[%c0_4, %c0_5] : memref<1x128xf32, #tpu.memory_space<vmem>>, vector<1x128xf32>
    %7 = vector.broadcast %6 : vector<1x128xf32> to vector<8x128xf32>
    %8 = arith.addf %5, %7 : vector<8x128xf32>
    %9 = vector.shape_cast %8 : vector<8x128xf32> to vector<1x8x128xf32>
    %cst_6 = arith.constant dense<0xFF800000> : vector<1x128xf32>
    %10 = vector.multi_reduction <maximumf>, %9, %cst_6 [1] : vector<1x8x128xf32> to vector<1x128xf32>
    %11 = vector.shape_cast %10 : vector<1x128xf32> to vector<1x1x128xf32>
    %12 = vector.broadcast %11 : vector<1x1x128xf32> to vector<1x8x128xf32>
    %13 = arith.subf %9, %12 : vector<1x8x128xf32>
    %14 = math.exp %13 : vector<1x8x128xf32>
    %cst_7 = arith.constant dense<0.000000e+00> : vector<1x128xf32>
    %15 = vector.multi_reduction <add>, %14, %cst_7 [1] : vector<1x8x128xf32> to vector<1x128xf32>
    %16 = vector.shape_cast %15 : vector<1x128xf32> to vector<1x1x128xf32>
    %17 = tpu.reciprocal %16 {approx = true} : vector<1x1x128xf32> -> vector<1x1x128xf32>
    %18 = vector.broadcast %17 : vector<1x1x128xf32> to vector<1x8x128xf32>
    %19 = arith.mulf %14, %18 : vector<1x8x128xf32>
    %c0_8 = arith.constant 0 : index
    %c0_9 = arith.constant 0 : index
    %20 = vector.load %arg2[%c0_8, %c0_9] : memref<8x32xbf16, #tpu.memory_space<vmem>>, vector<8x32xbf16>
    %c0_10 = arith.constant 0 : index
    %c0_11 = arith.constant 0 : index
    %21 = vector.load %arg6[%c0_10, %c0_11] : memref<32x128xbf16, #tpu.memory_space<vmem>>, vector<32x128xbf16>
    %cst_12 = arith.constant dense<0.000000e+00> : vector<8x128xf32>
    %22 = tpu.matmul %20, %21, %cst_12 {dimension_numbers = #tpu.dot_dimension_numbers<[1], [0], [0], [1], [0, 0, 1, 1], [], []>} : vector<8x32xbf16>, vector<32x128xbf16>, vector<8x128xf32> -> vector<8x128xf32>
    %23 = vector.shape_cast %22 : vector<8x128xf32> to vector<1x8x128xf32>
    %24 = arith.mulf %19, %23 : vector<1x8x128xf32>
    %cst_13 = arith.constant dense<0.000000e+00> : vector<1x128xf32>
    %25 = vector.multi_reduction <add>, %24, %cst_13 [1] : vector<1x8x128xf32> to vector<1x128xf32>
    %c0_14 = arith.constant 0 : index
    %c0_15 = arith.constant 0 : index
    %26 = vector.load %arg7[%c0_14, %c0_15] : memref<1x128xf32, #tpu.memory_space<vmem>>, vector<1x128xf32>
    %27 = arith.addf %25, %26 : vector<1x128xf32>
    %28 = vector.shape_cast %27 : vector<1x128xf32> to vector<1x1x128xf32>
    %c0_16 = arith.constant 0 : index
    %c0_17 = arith.constant 0 : index
    %c0_18 = arith.constant 0 : index
    %29 = vector.load %arg8[%c0_16, %c0_17, %c0_18] : memref<1x1x128xf32, #tpu.memory_space<vmem>>, vector<1x1x128xf32>
    tpu.vector_store %arg8[%c0_16, %c0_17, %c0_18], %28 {strides = array<i32>} : memref<1x1x128xf32, #tpu.memory_space<vmem>>, vector<1x1x128xf32>,
    return
  }
  func.func @transform_0(%arg0: i32, %arg1: i32) -> (i32, i32) {
    %c0_i32 = arith.constant 0 : i32
    %c0_i32_0 = arith.constant 0 : i32
    return %arg0, %c0_i32 : i32, i32
  }
  func.func @transform_1(%arg0: i32, %arg1: i32) -> (i32, i32) {
    %c0_i32 = arith.constant 0 : i32
    %c0_i32_0 = arith.constant 0 : i32
    %c0_i32_1 = arith.constant 0 : i32
    return %c0_i32, %c0_i32_0 : i32, i32
  }
  func.func @transform_2(%arg0: i32, %arg1: i32) -> (i32, i32) {
    %c0_i32 = arith.constant 0 : i32
    %c0_i32_0 = arith.constant 0 : i32
    return %c0_i32, %arg1 : i32, i32
  }
  func.func @transform_3(%arg0: i32, %arg1: i32) -> (i32, i32) {
    %c0_i32 = arith.constant 0 : i32
    %c0_i32_0 = arith.constant 0 : i32
    return %c0_i32, %arg1 : i32, i32
  }
  func.func @transform_4(%arg0: i32, %arg1: i32) -> (i32, i32) {
    %c0_i32 = arith.constant 0 : i32
    %c0_i32_0 = arith.constant 0 : i32
    return %c0_i32, %arg1 : i32, i32
  }
  func.func @transform_5(%arg0: i32, %arg1: i32) -> (i32, i32) {
    %c0_i32 = arith.constant 0 : i32
    %c0_i32_0 = arith.constant 0 : i32
    return %c0_i32, %arg1 : i32, i32
  }
  func.func @transform_6(%arg0: i32, %arg1: i32) -> (i32, i32, i32) {
    %c0_i32 = arith.constant 0 : i32
    %c0_i32_0 = arith.constant 0 : i32
    return %arg0, %c0_i32, %arg1 : i32, i32, i32
  }
}

</mosaic_0001>

<bundles_post_ra>
// kernel: tpu_custom_call.1
= control target key start
LH: loop header
LB: loop body
LE: loop exit
PB: predicated region body
PF: predicated region fallthrough
CT: control target
= control target key end

     0   :  { %11 = vsyncpa [#allocation4], 0  ;;  %s1102_s0 = inlined_call_operand.vmem [shape: bf16[16,32], index: 0, kind: input, shape index: {}]   ;;  %s1103_s1 = inlined_call_operand.vmem [shape: bf16[32,16], index: 1, kind: input, shape index: {}]   ;;  %s1104_s2 = inlined_call_operand.hbm [shape: bf16[16,128], index: 2, kind: input, shape index: {}]   ;;  %s1105_s3 = inlined_call_operand.vmem [shape: f32[1,128], index: 3, kind: input, shape index: {}]   ;;  %s1106_s4 = inlined_call_operand.vmem [shape: bf16[32,128], index: 4, kind: input, shape index: {}]   ;;  %s1107_s5 = inlined_call_operand.vmem [shape: f32[1,128], index: 5, kind: input, shape index: {}]   ;;  %s1108_s6 = inlined_call_operand.hbm [shape: f32[2,1,128], index: 6, kind: output, shape index: {}]  }
   0x1   :  { %12 = vsyncpa [#allocation5], 0 }
   0x2   :  { %14 = vsyncpa [#allocation5 + $0x1], 0  ;;  %s959_s21 = smov 0   ;;  %s961_s22 = smov 0  }
   0x3   :  { %s963_s23 = smov 0   ;;  %s965_s24 = smov 0  }
   0x4   :  { %s967_s25 = smov 0   ;;  %s969_s26 = smov 0  }
   0x5 LB: > { %s676_s27 = sadd.s32 4294967295, %s916_s26   ;;  %s677_s28 = sadd.s32 4294967294, %s916_s26   ;;  %s916_s26 = sphi %s969_s26, %s20_s26   ;;  %s912_s25 = sphi %s967_s25, %s1117_s25   ;;  %s908_s24 = sphi %s965_s24, %s1116_s24   ;;  %s904_s23 = sphi %s963_s23, %s1115_s23   ;;  %s900_s22 = sphi %s961_s22, %s1114_s22   ;;  %s896_s21 = sphi %s959_s21, %s1113_s21  }
   0x6   : > { %s32_s29 = sadd.s32 1, %s912_s25  ;;  %s192_s30 = sadd.s32 1, %s904_s23 }
   0x7   : > { %p34_p0 = scmp.ge.s32.totalorder %s32_s29, 2  ;;  %p202_p1 = scmp.ne.s32.totalorder %s904_s23, %s900_s22 }
   0x8   : > { %p203_p2 = scmp.eq.s32.totalorder %s676_s27, 1  ;;  %p208_p3 = scmp.ne.s32.totalorder %s900_s22, %s896_s21 }
   0x9   : > { %s1119_s29 = smov (%p34_p0, %s32_s29), 0  ;;  %p209_p5 = scmp.eq.s32.totalorder %s677_s28, 1 }
   0xa   : > { %p999_p4 = por %p203_p2, %p202_p1  ;;  %s187_s8 = ssub.s32 %s912_s25, %s1119_s29 }
   0xb   : > { %p678_p6 = scmp.ge.s32.totalorder %s916_s26, 1  ;;  %p190_p7 = scmp.eq.s32.totalorder %s187_s8, 0 }
   0xc   : > { %p1006_p8 = por %p209_p5, %p208_p3  ;;  %p216_p9 = scmp.lt.s32.totalorder %s916_s26, 3 }
   0xd   : > { %s1012_s10 = scalar_select %p190_p7, %s904_s23, %s192_s30  }
   0xe   : > { %p1014_p10 = pnand %p678_p6, %p216_p9  ;;  %p1018_p11 = scmp.eq.s32.totalorder %s676_s27, 0 }
   0xf   : > { %s918_s13 = smov [#allocation3]  }
  0x10   : > { %p735_p12 = pneg %p1014_p10  ;;  %s233_s14 = sshll.u32 %s918_s13, 4  ;;  %s234_s14 = int_to_ptr.vmem [resolvable:$true] %s233_s14 }
  0x11   : > { %s821_s15 = scalar_lea.vmem %s234_s14, 128  ;;  %p829_p5 = scmp.lt.s32.totalorder %s234_s14, %s234_s14 }
  0x12   : > { %p736_p13 = pnand %p1018_p11, %p735_p12  ;;  %p822_p1 = scmp.ne.s32.totalorder %s234_s14, %s821_s15 }
  0x13   : > { %p830_p6 = scmp.lt.s32.totalorder %s821_s15, %s821_s15 }
  0x14   : > { %p812_p0 = pneg %p736_p13 }
  0x15   : > { %p831_p7 = por %p830_p6, %p829_p5 }
  0x16   : > { %p824_p2 = pnand %p822_p1, %p812_p0 }
  0x18   : > { %p825_p3 = pneg %p824_p2 }
  0x1a   : > { %p832_p9 = pnand %p831_p7, %p825_p3 }
  0x1c   : > { %835 = shalt.err (!%p832_p9)
}
  0x1d   : > { %s919_s16 = smov 64   ;;  %s920_s17 = smov 4  }
  0x1e   : > { %738 = dma.hbm_to_vmem [thread:$0]  (!%p736_p13), %s1104_s2, 128, %s234_s14, [#allocation4], %s919_s16, %s919_s16, %s920_s17  }
  0x1f   : > { %275 = sbr.rel (%p1014_p10) target bundleno = 546 (0x222), region = 44 }
  0x24   : > { %887 = dma.done.wait (%p1018_p11), [#allocation4], 128  }
  0x25   : > { %889 = vsyncadd (%p1018_p11), [#allocation4], 4294967168  ;;  %p313_p12 = scmp.lt.s32.totalorder %s908_s24, 1  ;;  %v921_v0 = vmov 0.0   ;;  %vm922_vm0 = vmmov 0   ;;  %v799_v1 = vld [vmem:[%s1103_s1 + $0x8] sm:$0xff]  }
  0x26   : > { %707 = vmatprep.subr.bf16.mxu0 %v921_v0  ;;  %711 = vmatprep.mubr.msk.bf16.mxu0 %vm922_vm0, %v921_v0  ;;  %v800_v2 = vld [vmem:[%s1103_s1] sm:$0xff]   ;;  %vm349_vm1 = vcmask 261120   ;;  %vm395_vm2 = vcmask 125952   ;;  %vm413_vm3 = vcmask 130048   ;;  %v802_v11 = vld [vmem:[%s1106_s4 + $0x8] sm:$0xff]   ;;  %s311_s27 = sand.u32 1, %s900_s22  }
  0x27   : > { %715 = vmatprep.subr.bf16.mxu1 %v921_v0  ;;  %717 = vmatprep.mubr.msk.bf16.mxu1 %vm922_vm0, %v921_v0  ;;  %s314_s20 = scalar_select %p313_p12, %s908_s24, 1  ;;  %v801_v4 = vld [vmem:[#allocation3] sm:$0xff]   ;;  %v690_v15 = vld [vmem:[%s1105_s3] ss:$0 sm:$0xff] }
  0x28   : > { %708 = vmatpush3.bf16.msra.mxu0 %v799_v1  ;;  %716 = vmatpush3.bf16.msra.mxu1 %v801_v4  ;;  %v803_v13 = vld [vmem:[%s1106_s4] sm:$0xff]   ;;  %s696_s8 = sshll.u32 %s908_s24, 4  ;;  %s312_s11 = scalar_lea.vmem [#allocation6], %s311_s27 }
  0x29   : > { %s686_s30 = sshll.u32 %s314_s20, 2  ;;  %709 = vmatprep.subr.bf16.mxu0 %v921_v0  ;;  %721 = vmatprep.subr.bf16.mxu1 %v921_v0  ;;  %v542_v48 = vld [vmem:[%s1107_s5] sm:$0x1]  ;;  %s559_s12 = sshll.u32 %s312_s11, 4  ;;  %s560_s12 = int_to_ptr.vmem [resolvable:$true] %s559_s12 }
  0x2a   : > { %s316_s14 = scalar_lea.vmem %s1102_s0, %s686_s30  ;;  %s557_s15 = scalar_lea.hbm %s1108_s6, %s696_s8 }
  0x2b   : > { %v332_v3 = vld [vmem:[%s316_s14] sm:$0xf]  ;;  %s546_s16 = scalar_lea.sflag [#allocation5], %s311_s27  ;;  %s836_s17 = scalar_lea.vmem %s560_s12, 16 }
  0x2c   : > { %710 = vmatpush3.bf16.msra.mxu0 %v800_v2  ;;  %v474_v14 = vld [vmem:[%s316_s14] sm:$0xf]  ;;  %p837_p10 = scmp.ne.s32.totalorder %s560_s12, %s836_s17  ;;  %s923_s18 = smov [#allocation6]  }
  0x2d   : > { %s840_s19 = sshll.u32 %s923_s18, 4  ;;  %s841_s19 = int_to_ptr.vmem [resolvable:$false] %s840_s19 }
  0x2e   : > { %p838_p11 = pnand %p837_p10, %p999_p4  ;;  %s842_s24 = scalar_lea.vmem %s841_s19, 32 }
  0x2f   : > { %712 = vmatmul.mubr.msk.bf16.vlgmr.msra.gmra.mxu0 %vm349_vm1, %v332_v3  ;;  %p843_p0 = scmp.lt.s32.totalorder %s560_s12, %s841_s19  ;;  %p844_p1 = scmp.lt.s32.totalorder %s842_s24, %s836_s17 }
  0x30   : > { %p839_p13 = pneg %p838_p11 }
  0x31   : > { %p845_p2 = por %p844_p1, %p843_p0 }
  0x33   : > { %p846_p3 = pnand %p845_p2, %p839_p13 }
  0xef   : > { %v387_v5 = vpop.f32.mrf.mxu0 }
  0xf0   : > { %804 = vtanh.f32 %v387_v5 }
  0xf1   : > { %v713_v6 = vpop.f32.mrf.mxu0 }
  0xf3   : > { %v390_v7 = vpop.f32.mrf.mxu0 }
  0xf5   : > { %v714_v8 = vpop.f32.mrf.mxu0 }
  0xfd   : > { %v805_v9 = vpop.eup %804 }
  0xfe   : > { %v394_v10 = vpack.c.bf16 %v805_v9, %v805_v9 }
 0x100   : > { %396 = vst.msk [vmem:[#allocation2] sm:$0xf] %vm395_vm2, %v394_v10 }
 0x107   : > { %v397_v12 = vld [vmem:[#allocation2] sm:$0xf] }
 0x108   : > { %718 = vmatmul.mubr.msk.bf16.vlgmr.msra.gmra.mxu1 %vm413_vm3, %v397_v12 }
 0x109   : > { %722 = vmatpush3.bf16.msra.mxu1 %v802_v11  ;;  %725 = vmatprep.mubr.msk.bf16.mxu1 %vm922_vm0, %v921_v0 }
 0x10a   : > { %723 = vmatprep.subr.bf16.mxu1 %v921_v0 }
 0x10d   : > { %724 = vmatpush3.bf16.msra.mxu1 %v803_v13 }
 0x110   : > { %726 = vmatmul.mubr.msk.bf16.vlgmr.msra.gmra.mxu1 %vm349_vm1, %v474_v14 }
 0x1c8   : > { %v451_v16 = vpop.f32.mrf.mxu1 }
 0x1c9   : > { %v452_v17 = vadd.f32 %v690_v15, %v451_v16 }
 0x1ca   : > { %v719_v18 = vpop.f32.mrf.mxu1 }
 0x1cb   : > { %v457_v19 = vrot.slane %v452_v17, 4 }
 0x1cc   : > { %v454_v20 = vpop.f32.mrf.mxu1 }
 0x1cd   : > { %v458_v21 = vmax.f32 %v452_v17, %v457_v19 }
 0x1ce   : > { %v720_v22 = vpop.f32.mrf.mxu1 }
 0x1cf   : > { %v459_v23 = vrot.slane %v458_v21, 2 }
 0x1d0   : > { %v529_v24 = vpop.f32.mrf.mxu1 }
 0x1d1   : > { %v460_v25 = vmax.f32 %v458_v21, %v459_v23 }
 0x1d2   : > { %v727_v26 = vpop.f32.mrf.mxu1 }
 0x1d3   : > { %v461_v27 = vrot.slane %v460_v25, 1 }
 0x1d4   : > { %v532_v28 = vpop.f32.mrf.mxu1 }
 0x1d5   : > { %v462_v29 = vmax.f32 %v460_v25, %v461_v27 }
 0x1d6   : > { %v728_v30 = vpop.f32.mrf.mxu1 }
 0x1d7   : > { %v463_v31 = vsub.f32 %v452_v17, %v462_v29 }
 0x1d9   : > { %v464_v32 = vmul.f32 1.442695, %v463_v31 }
 0x1db   : > { %806 = vpow2.f32 %v464_v32 }
 0x1e8   : > { %v807_v33 = vpop.eup %806 }
 0x1e9   : > { %v466_v34 = vrot.slane %v807_v33, 4 }
 0x1eb   : > { %v467_v35 = vadd.f32 %v807_v33, %v466_v34 }
 0x1ed   : > { %v468_v36 = vrot.slane %v467_v35, 2 }
 0x1ef   : > { %v469_v37 = vadd.f32 %v468_v36, %v467_v35 }
 0x1f1   : > { %v470_v38 = vrot.slane %v469_v37, 1 }
 0x1f3   : > { %v471_v39 = vadd.f32 %v470_v38, %v469_v37 }
 0x1f5   : > { %808 = vrcp.f32 %v471_v39 }
 0x202   : > { %v809_v40 = vpop.eup %808 }
 0x203   : > { %v473_v41 = vmul.f32 %v809_v40, %v807_v33 }
 0x205   : > { %v535_v42 = vmul.f32 %v529_v24, %v473_v41 }
 0x207   : > { %v536_v43 = vrot.slane %v535_v42, 4 }
 0x209   : > { %v537_v44 = vadd.f32 %v536_v43, %v535_v42 }
 0x20b   : > { %v538_v45 = vrot.slane %v537_v44, 2 }
 0x20d   : > { %v539_v46 = vadd.f32 %v538_v45, %v537_v44 }
 0x20f   : > { %v540_v47 = vrot.slane %v539_v46, 1 }
 0x211   : > { %v541_v49 = vadd.f32 %v540_v47, %v539_v46 }
 0x213   : > { %v543_v50 = vadd.f32 %v542_v48, %v541_v49 }
 0x215   : > { %544 = vst [vmem:[%s312_s11] sm:$0x1] %v543_v50 }
 0x216   : > { %849 = shalt.err (!%p846_p3)
}
 0x217   : > { %s850_s20 = scalar_lea.hbm %s557_s15, 16  ;;  %s854_s30 = scalar_lea.hbm %s1108_s6, 32 }
 0x218   : > { %p851_p5 = scmp.ne.s32.totalorder %s557_s15, %s850_s20  ;;  %p855_p9 = scmp.lt.s32.totalorder %s557_s15, %s1108_s6 }
 0x219   : > { %p856_p12 = scmp.lt.s32.totalorder %s854_s30, %s850_s20 }
 0x21a   : > { %p852_p6 = pnand %p851_p5, %p999_p4 }
 0x21b   : > { %p857_p10 = por %p856_p12, %p855_p9 }
 0x21c   : > { %p853_p7 = pneg %p852_p6 }
 0x21e   : > { %p858_p11 = pnand %p857_p10, %p853_p7 }
 0x220   : > { %861 = shalt.err (!%p858_p11)
}
 0x221   : > { %733 = dma.vmem_to_hbm [thread:$0]  (%p999_p4), %s560_s12, 16, %s557_s15, %s546_s16  }
 0x222 PF: > { %p745_p13 = scmp.ge.s32.totalorder %s916_s26, 2  ;;  %s571_s13 = sand.u32 1, %s896_s21  }
 0x223   : > { %s572_s14 = scalar_lea.sflag [#allocation5], %s571_s13 }
 0x224   : > { %p740_p0 = pnand %p745_p13, %p1006_p8 }
 0x226   : > { %p741_p1 = pneg %p740_p0 }
 0x228   : > { %891 = dma.done.wait (%p741_p1), %s572_s14, 16  }
 0x229   : > { %893 = vsyncadd (%p741_p1), %s572_s14, 4294967280  ;;  %s20_s26 = sadd.s32 1, %s916_s26   ;;  %s1113_s21 = smov %s900_s22 }
 0x22a   : > { %p17_p2 = scmp.ge.s32.totalorder %s20_s26, 4   ;;  %s1114_s22 = smov %s904_s23 }
 0x22b   : > { %s1115_s23 = smov %s1012_s10  ;;  %s1116_s24 = smov %s912_s25 }
 0x22c   : > { %s1117_s25 = smov %s1119_s29  ;;  %19 = sbr.rel (!%p17_p2) target bundleno = 5 (0x5), region = 98 }
 0x231   :  { %576 = vsyncpa [#allocation4], 1 }
 0x232   :  { %578 = vsyncpa [#allocation4 + $0x1], 1 }
 0x233   :  { %579 = vsyncpa [#allocation5], 1 }
 0x234   :  { %581 = vsyncpa [#allocation5 + $0x1], 1 }

</bundles_post_ra>
